<compile_context>
chip_gen: v6e
topology: v6e:2x2x1
jax: 0.10.0
libtpu: 0.0.40
codegen_flags: <defaults>
</compile_context>

<pallas_src>
import jax
import jax.numpy as jnp
from jax.experimental import pallas as pl
from jax.experimental.pallas import tpu as pltpu


def _round_up(x: int, m: int) -> int:
    return (x + m - 1) // m * m


# ---------------------------------------------------------------------------
# Fused kernel — one batch tile (Bt questions) per grid step.
#   proj   = q @ Wq^T                           (Bt*Lp, Dp)  -- MXU, f32 acc
#   logits = sum(proj * w_sa, -1)               (Bt, Lp, 1)  -- VPU mul + reduce
#   attn   = renorm(softmax(logits) * mask)     (Bt, Lp, 1)
#   qpool  = sum(attn * proj, L) + bq           (Bt, Dp)
#   new_ocr_mask[b, n] = any_k(temporal_id[b, n] == where(gf==0,1,gf)[b, k])
# ---------------------------------------------------------------------------
def _grounding_fused_kernel(q_ref, m_ref, wq_ref, bq_ref, wsa_ref,
                            gf_ref, tid_ref,
                            qpool_ref, ocrmask_ref):
    Bt, Lp, _ = m_ref.shape
    Dp = wq_ref.shape[1]

    # (1) q_linear matmul on the MXU with f32 accumulation.  bq is deferred to
    #     the pooled output (sum(attn) == 1), so no (Bt*Lp, Dp) bias add here.
    proj2 = jnp.dot(q_ref[...], wq_ref[...],
                    preferred_element_type=jnp.float32)              # (Bt*Lp, Dp)

    # (2) self_attn logits via VPU multiply + lane reduce (a degenerate N=1
    #     MXU matmul would waste a vmatmul push).  self_attn bias and the bq
    #     contribution are uniform shifts -> dropped (softmax shift-invariant).
    logits2 = jnp.sum(proj2 * wsa_ref[...], axis=-1, keepdims=True)  # (Bt*Lp, 1)

    proj = proj2.reshape(Bt, Lp, Dp)     # free: Lp is a multiple of the sublane pack
    logits = logits2.reshape(Bt, Lp, 1)
    mask = m_ref[...]                    # (Bt, Lp, 1), 0/1 float

    # (3) softmax -> mask -> renormalize (reference order; the plain-softmax
    #     denominator cancels in the renorm so only max/exp/sum survive).
    #     Padded question positions carry mask == 0 and drop out.
    mx = jnp.max(logits, axis=1, keepdims=True)                      # (Bt, 1, 1)
    p = jnp.exp(logits - mx) * mask                                  # (Bt, Lp, 1)
    attn = p / (jnp.sum(p, axis=1, keepdims=True) + 1e-12)

    # (4) attention-pooled global question feature, lane-dense (Bt, Dp) store.
    qpool = jnp.sum(attn * proj, axis=1) + bq_ref[...]               # (Bt, Dp)
    qpool_ref[...] = qpool.astype(qpool_ref.dtype)

    # (5) stage-2 new_ocr_mask (eq + nonzero + scatter == any over top-k
    #     frames); padded Np lanes -> unmasked vst.  Free filler under the MXU.
    gf = gf_ref[...]                                                 # (Bt, K, 1)
    gf = jnp.where(gf == 0, jnp.int32(1), gf)
    eq = (tid_ref[...] == gf).astype(jnp.float32)                    # (Bt, K, Np)
    ocrmask_ref[...] = jnp.max(eq, axis=1)                           # (Bt, Np)


def grounding_fused(q_feat, q_mask, wq_t, bq, w_sa,
                    ground_frame, temporal_id,
                    *, compute_dtype=jnp.bfloat16, batch_tile=8):
    """Returns (global_q_feat (B,1,D) f32, new_ocr_mask (B,N) f32)."""
    B, L, D = q_feat.shape
    K = ground_frame.shape[1]
    N = temporal_id.shape[1]

    # ---- padding for TPU tiling constraints and lane-dense stores ----------
    SUBLANE = 16                               # safe pack for both f32(8) and bf16(16)
    Lp = _round_up(L, SUBLANE)                 # free (Bt*Lp,Dp)->(Bt,Lp,Dp) reshape
    Dp = _round_up(D, 128)                     # MXU K/N alignment, lane-dense qpool
    Np = _round_up(N, 128)                     # lane-dense ocr-mask store
    Bt = _round_up(max(1, min(batch_tile, B)), 8)  # output-tile sublane constraint
    Bp = _round_up(B, Bt)
    grid = (Bp // Bt,)

    q_p = jnp.pad(q_feat.astype(jnp.float32),
                  ((0, Bp - B), (0, Lp - L), (0, Dp - D)))
    q2 = q_p.reshape(Bp * Lp, Dp).astype(compute_dtype)          # lane-dense MXU LHS
    mask3 = jnp.pad(q_mask.astype(jnp.float32),
                    ((0, Bp - B), (0, Lp - L))).reshape(Bp, Lp, 1)
    wq = jnp.pad(wq_t.astype(jnp.float32),
                 ((0, Dp - D), (0, Dp - D))).astype(compute_dtype)
    bq2 = jnp.pad(bq.astype(jnp.float32), (0, Dp - D)).reshape(1, Dp)
    wsa2 = jnp.pad(w_sa.astype(jnp.float32), (0, Dp - D)).reshape(1, Dp)
    gf3 = jnp.pad(ground_frame.astype(jnp.int32),
                  ((0, Bp - B), (0, 0))).reshape(Bp, K, 1)
    tid3 = jnp.pad(temporal_id.astype(jnp.int32),
                   ((0, Bp - B), (0, Np - N))).reshape(Bp, 1, Np)

    # ---- VMEM budget: double-buffered per-tile I/O + live f32 intermediates -
    in_dt = jnp.dtype(compute_dtype).itemsize
    tile_in = (Bt * Lp * Dp * in_dt           # q tile
               + Dp * Dp * in_dt              # resident Wq
               + Bt * Lp * 4 + 2 * Dp * 4     # mask, bq, w_sa
               + Bt * K * 4 + Bt * Np * 4)    # ground_frame, temporal_id
    tile_out = Bt * Dp * 4 + Bt * Np * 4
    live_f32 = 2 * Bt * Lp * Dp * 4           # proj + attn*proj intermediates
    vmem_bytes = int(min(max(2 * (tile_in + tile_out) + live_f32 + (4 << 20),
                             8 << 20), 64 << 20))

    cost = pl.CostEstimate(
        flops=2 * Bp * Lp * Dp * Dp + 4 * Bp * Lp * Dp,
        transcendentals=Bp * Lp,
        bytes_accessed=(q2.size * in_dt + wq.size * in_dt + mask3.size * 4
                        + gf3.size * 4 + tid3.size * 4
                        + Bp * Dp * 4 + Bp * Np * 4))

    qpool, new_ocr_mask = pl.pallas_call(
        _grounding_fused_kernel,
        grid=grid,
        out_shape=(
            jax.ShapeDtypeStruct((Bp, Dp), jnp.float32),
            jax.ShapeDtypeStruct((Bp, Np), jnp.float32),
        ),
        in_specs=[
            pl.BlockSpec((Bt * Lp, Dp), lambda i: (i, 0)),    # q rows: tiled
            pl.BlockSpec((Bt, Lp, 1), lambda i: (i, 0, 0)),   # mask: tiled
            pl.BlockSpec((Dp, Dp), lambda i: (0, 0)),         # Wq: resident
            pl.BlockSpec((1, Dp), lambda i: (0, 0)),          # bq: resident
            pl.BlockSpec((1, Dp), lambda i: (0, 0)),          # w_sa: resident
            pl.BlockSpec((Bt, K, 1), lambda i: (i, 0, 0)),    # ground_frame
            pl.BlockSpec((Bt, 1, Np), lambda i: (i, 0, 0)),   # temporal_id
        ],
        out_specs=(
            pl.BlockSpec((Bt, Dp), lambda i: (i, 0)),
            pl.BlockSpec((Bt, Np), lambda i: (i, 0)),
        ),
        compiler_params=pltpu.CompilerParams(
            dimension_semantics=("parallel",),   # shard batch tiles across TCs (v7x)
            vmem_limit_bytes=vmem_bytes),
        cost_estimate=cost,
    )(q2, mask3, wq, bq2, wsa2, gf3, tid3)

    return qpool[:B, :D].reshape(B, 1, D), new_ocr_mask[:B, :N]


# ---------------------------------------------------------------------------
# Wrapper mimicking Grounding_Module.forward's defined compute.
# ---------------------------------------------------------------------------
def grounding_module_forward(params, fwd_results, sample_list,
                             *, compute_dtype=jnp.bfloat16):
    q_feat = fwd_results["txt_emb"]
    q_mask = fwd_results["txt_mask"]

    # TODO(synk): frame_grounding_indicator / ocr_grounding_indicator / BertEncoder
    # definitions are not given; `ground_frame` is taken from sample_list here.
    ground_frame = sample_list["ground_frame"]

    global_q_feat, new_ocr_mask = grounding_fused(
        q_feat, q_mask,
        params["q_linear_w_t"], params["q_linear_b"], params["self_attn_w"],
        ground_frame, sample_list["temporal_id"],
        compute_dtype=compute_dtype,
    )

    out = dict(fwd_results)
    out["global_q_feat"] = global_q_feat
    out["ground_frame"] = ground_frame
    out["new_ocr_mask"] = new_ocr_mask
    out["pos_obj_mmt_in"] = fwd_results["obj_mmt_in"]
    out["pos_ocr_mmt_in"] = fwd_results["ocr_mmt_in"]
    out["neg_obj_mmt_in"] = fwd_results["obj_mmt_in"]
    out["neg_ocr_mmt_in"] = fwd_results["ocr_mmt_in"]
    return out


# ---------------------------------------------------------------------------
# Pure-JAX reference (matches the PyTorch module, including b_sa, bq and the
# softmax -> mask -> renormalize order).
# ---------------------------------------------------------------------------
def _ref_q_pool(q_feat, q_mask, wq_t, bq, w_sa, b_sa):
    proj = jnp.einsum("bld,de->ble", q_feat, wq_t) + bq
    logits = jnp.einsum("bld,d->bl", proj, w_sa) + b_sa
    attn = jax.nn.softmax(logits, axis=-1)
    attn = attn * q_mask
    attn = attn / (jnp.sum(attn, axis=1, keepdims=True) + 1e-12)
    return jnp.einsum("bl,bld->bd", attn, proj)[:, None, :]


def _ref_ocr_mask(ground_frame, temporal_id):
    t1 = jnp.where(ground_frame == 0, 1, ground_frame)
    eq = temporal_id[:, None, :] == t1[:, :, None]          # (B, K, N)
    return jnp.any(eq, axis=1).astype(jnp.float32)


if __name__ == "__main__":
    key = jax.random.PRNGKey(0)
    B, L, D = 2, 8, 32        # batch, question length, hidden size
    N_OCR, N_FRAME, FRAME_TOPK, FRAME_NUM = 16, 6, 4, 6

    ks = jax.random.split(key, 12)
    params = {
        "q_linear_w_t": jax.random.normal(ks[0], (D, D), jnp.float32) * 0.05,
        "q_linear_b": jax.random.normal(ks[1], (D,), jnp.float32) * 0.05,
        "self_attn_w": jax.random.normal(ks[2], (D,), jnp.float32) * 0.05,
        "self_attn_b": jnp.float32(0.01),
    }

    q_feat = jax.random.normal(ks[3], (B, L, D), jnp.float32)
    q_mask = (jax.random.uniform(ks[4], (B, L)) > 0.2).astype(jnp.float32)
    q_mask = q_mask.at[:, 0].set(1.0)  # ensure at least one valid token
    ocr_feat = jax.random.normal(ks[5], (B, N_OCR, D), jnp.float32)
    frame_feat = jax.random.normal(ks[6], (B, N_FRAME, D), jnp.float32)

    fwd_results = {
        "txt_emb": q_feat,
        "txt_mask": q_mask,
        "ocr_mmt_in": ocr_feat,
        "ocr_mask": jnp.ones((B, N_OCR), jnp.float32),
        "obj_mmt_in": frame_feat,
        "obj_mask": jnp.ones((B, N_FRAME), jnp.float32),
    }
    sample_list = {
        "temporal_id": jax.random.randint(ks[7], (B, N_OCR), 1, FRAME_NUM + 1),
        "ground_frame": jax.random.randint(ks[8], (B, FRAME_TOPK), 0, FRAME_NUM + 1),
    }

    ref_q = _ref_q_pool(q_feat, q_mask, params["q_linear_w_t"],
                        params["q_linear_b"], params["self_attn_w"],
                        params["self_attn_b"])
    ref_m = _ref_ocr_mask(sample_list["ground_frame"], sample_list["temporal_id"])

    # ---- f32 path: tight check against the PyTorch-semantics reference
    gq32, om32 = grounding_fused(
        q_feat, q_mask, params["q_linear_w_t"], params["q_linear_b"],
        params["self_attn_w"], sample_list["ground_frame"],
        sample_list["temporal_id"], compute_dtype=jnp.float32)
    jax.block_until_ready(gq32)
    assert jnp.allclose(gq32, ref_q, atol=1e-4, rtol=1e-4)
    assert jnp.allclose(om32, ref_m)

    # ---- default bf16-input / f32-accumulation path via the module wrapper
    out = grounding_module_forward(params, fwd_results, sample_list)
    jax.block_until_ready(out["global_q_feat"])
    jax.block_until_ready(out["new_ocr_mask"])
    assert jnp.allclose(out["global_q_feat"], ref_q, atol=5e-2, rtol=5e-2)
    assert jnp.allclose(out["new_ocr_mask"], ref_m)

    # ---- multi-tile path (B=10 -> padded 16, batch_tile=8 -> grid=(2,)), f32
    B2 = 10
    q_feat2 = jax.random.normal(ks[9], (B2, L, D), jnp.float32)
    q_mask2 = (jax.random.uniform(ks[10], (B2, L)) > 0.3).astype(jnp.float32)
    q_mask2 = q_mask2.at[:, 0].set(1.0)
    tid2 = jax.random.randint(ks[11], (B2, N_OCR), 1, FRAME_NUM + 1)
    gf2 = jax.random.randint(ks[7], (B2, FRAME_TOPK), 0, FRAME_NUM + 1)

    gq2, om2 = grounding_fused(
        q_feat2, q_mask2, params["q_linear_w_t"], params["q_linear_b"],
        params["self_attn_w"], gf2, tid2,
        compute_dtype=jnp.float32, batch_tile=8)
    jax.block_until_ready(gq2)
    ref_q2 = _ref_q_pool(q_feat2, q_mask2, params["q_linear_w_t"],
                         params["q_linear_b"], params["self_attn_w"],
                         params["self_attn_b"])
    ref_m2 = _ref_ocr_mask(gf2, tid2)
    assert jnp.allclose(gq2, ref_q2, atol=1e-4, rtol=1e-4)
    assert jnp.allclose(om2, ref_m2)

    print("KERNEL_OK")
</pallas_src>

<mosaic_0001>
module attributes {stable_mosaic.version = 11 : i64} {
  func.func @_grounding_fused_kernel(%arg0: i32, %arg1: memref<128x128xf32, #tpu.memory_space<vmem>>, %arg2: memref<8x16x1xf32, #tpu.memory_space<vmem>>, %arg3: memref<128x128xf32, #tpu.memory_space<vmem>>, %arg4: memref<1x128xf32, #tpu.memory_space<vmem>>, %arg5: memref<1x128xf32, #tpu.memory_space<vmem>>, %arg6: memref<8x4x1xi32, #tpu.memory_space<vmem>>, %arg7: memref<8x1x128xi32, #tpu.memory_space<vmem>>, %arg8: memref<8x128xf32, #tpu.memory_space<vmem>>, %arg9: memref<8x128xf32, #tpu.memory_space<vmem>>) attributes {dimension_semantics = [#tpu.dimension_semantics<parallel>], iteration_bounds = array<i64: 1>, scalar_prefetch = 0 : i64, scratch_operands = 0 : i64, tpu.core_type = #tpu.core_type<tc>, window_params = [{transform_indices = @transform_0, window_bounds = array<i64: 128, 128>}, {transform_indices = @transform_1, window_bounds = array<i64: 8, 16, 1>}, {pipeline_mode = #tpu.pipeline_mode<synchronous>, transform_indices = @transform_2, window_bounds = array<i64: 128, 128>}, {pipeline_mode = #tpu.pipeline_mode<synchronous>, transform_indices = @transform_3, window_bounds = array<i64: 1, 128>}, {pipeline_mode = #tpu.pipeline_mode<synchronous>, transform_indices = @transform_4, window_bounds = array<i64: 1, 128>}, {transform_indices = @transform_5, window_bounds = array<i64: 8, 4, 1>}, {transform_indices = @transform_6, window_bounds = array<i64: 8, 1, 128>}, {transform_indices = @transform_7, window_bounds = array<i64: 8, 128>}, {transform_indices = @transform_8, window_bounds = array<i64: 8, 128>}]} {
    %c0 = arith.constant 0 : index
    %c0_0 = arith.constant 0 : index
    %0 = vector.load %arg1[%c0, %c0_0] : memref<128x128xf32, #tpu.memory_space<vmem>>, vector<128x128xf32>
    %c0_1 = arith.constant 0 : index
    %c0_2 = arith.constant 0 : index
    %1 = vector.load %arg3[%c0_1, %c0_2] : memref<128x128xf32, #tpu.memory_space<vmem>>, vector<128x128xf32>
    %cst = arith.constant dense<0.000000e+00> : vector<128x128xf32>
    %2 = tpu.matmul %0, %1, %cst {dimension_numbers = #tpu.dot_dimension_numbers<[1], [0], [0], [1], [0, 0, 1, 1], [], []>} : vector<128x128xf32>, vector<128x128xf32>, vector<128x128xf32> -> vector<128x128xf32>
    %c0_3 = arith.constant 0 : index
    %c0_4 = arith.constant 0 : index
    %3 = vector.load %arg5[%c0_3, %c0_4] : memref<1x128xf32, #tpu.memory_space<vmem>>, vector<1x128xf32>
    %4 = vector.broadcast %3 : vector<1x128xf32> to vector<128x128xf32>
    %5 = arith.mulf %2, %4 : vector<128x128xf32>
    %cst_5 = arith.constant dense<0.000000e+00> : vector<128xf32>
    %6 = vector.multi_reduction <add>, %5, %cst_5 [1] : vector<128x128xf32> to vector<128xf32>
    %7 = vector.shape_cast %6 : vector<128xf32> to vector<128x1xf32>
    %8 = vector.shape_cast %2 : vector<128x128xf32> to vector<8x16x128xf32>
    %9 = vector.shape_cast %7 : vector<128x1xf32> to vector<8x16x1xf32>
    %c0_6 = arith.constant 0 : index
    %c0_7 = arith.constant 0 : index
    %c0_8 = arith.constant 0 : index
    %10 = vector.load %arg2[%c0_6, %c0_7, %c0_8] : memref<8x16x1xf32, #tpu.memory_space<vmem>>, vector<8x16x1xf32>
    %cst_9 = arith.constant dense<0xFF800000> : vector<8x1xf32>
    %11 = vector.multi_reduction <maximumf>, %9, %cst_9 [1] : vector<8x16x1xf32> to vector<8x1xf32>
    %12 = vector.shape_cast %11 : vector<8x1xf32> to vector<8x1x1xf32>
    %13 = vector.broadcast %12 : vector<8x1x1xf32> to vector<8x16x1xf32>
    %14 = arith.subf %9, %13 : vector<8x16x1xf32>
    %15 = math.exp %14 : vector<8x16x1xf32>
    %16 = arith.mulf %15, %10 : vector<8x16x1xf32>
    %cst_10 = arith.constant dense<0.000000e+00> : vector<8x1xf32>
    %17 = vector.multi_reduction <add>, %16, %cst_10 [1] : vector<8x16x1xf32> to vector<8x1xf32>
    %18 = vector.shape_cast %17 : vector<8x1xf32> to vector<8x1x1xf32>
    %cst_11 = arith.constant 9.99999996E-13 : f32
    %19 = vector.broadcast %cst_11 : f32 to vector<8x1x1xf32>
    %20 = arith.addf %18, %19 : vector<8x1x1xf32>
    %21 = vector.broadcast %20 : vector<8x1x1xf32> to vector<8x16x1xf32>
    %22 = arith.divf %16, %21 : vector<8x16x1xf32>
    %23 = vector.broadcast %22 : vector<8x16x1xf32> to vector<8x16x128xf32>
    %24 = arith.mulf %23, %8 : vector<8x16x128xf32>
    %cst_12 = arith.constant dense<0.000000e+00> : vector<8x128xf32>
    %25 = vector.multi_reduction <add>, %24, %cst_12 [1] : vector<8x16x128xf32> to vector<8x128xf32>
    %c0_13 = arith.constant 0 : index
    %c0_14 = arith.constant 0 : index
    %26 = vector.load %arg4[%c0_13, %c0_14] : memref<1x128xf32, #tpu.memory_space<vmem>>, vector<1x128xf32>
    %27 = vector.broadcast %26 : vector<1x128xf32> to vector<8x128xf32>
    %28 = arith.addf %25, %27 : vector<8x128xf32>
    %c0_15 = arith.constant 0 : index
    %c0_16 = arith.constant 0 : index
    %29 = vector.load %arg8[%c0_15, %c0_16] : memref<8x128xf32, #tpu.memory_space<vmem>>, vector<8x128xf32>
    tpu.vector_store %arg8[%c0_15, %c0_16], %28 {strides = array<i32>} : memref<8x128xf32, #tpu.memory_space<vmem>>, vector<8x128xf32>,
    %c0_17 = arith.constant 0 : index
    %c0_18 = arith.constant 0 : index
    %c0_19 = arith.constant 0 : index
    %30 = vector.load %arg6[%c0_17, %c0_18, %c0_19] : memref<8x4x1xi32, #tpu.memory_space<vmem>>, vector<8x4x1xi32>
    %c0_i32 = arith.constant 0 : i32
    %31 = vector.broadcast %c0_i32 : i32 to vector<8x4x1xi32>
    %32 = arith.cmpi eq, %30, %31 : vector<8x4x1xi32>
    %c1_i32 = arith.constant 1 : i32
    %33 = vector.broadcast %c1_i32 : i32 to vector<8x4x1xi32>
    %34 = arith.select %32, %33, %30 : vector<8x4x1xi1>, vector<8x4x1xi32>
    %c0_20 = arith.constant 0 : index
    %c0_21 = arith.constant 0 : index
    %c0_22 = arith.constant 0 : index
    %35 = vector.load %arg7[%c0_20, %c0_21, %c0_22] : memref<8x1x128xi32, #tpu.memory_space<vmem>>, vector<8x1x128xi32>
    %36 = vector.broadcast %35 : vector<8x1x128xi32> to vector<8x4x128xi32>
    %37 = vector.broadcast %34 : vector<8x4x1xi32> to vector<8x4x128xi32>
    %38 = arith.cmpi eq, %36, %37 : vector<8x4x128xi32>
    %39 = arith.extui %38 : vector<8x4x128xi1> to vector<8x4x128xi32>
    %40 = arith.sitofp %39 : vector<8x4x128xi32> to vector<8x4x128xf32>
    %cst_23 = arith.constant dense<0xFF800000> : vector<8x128xf32>
    %41 = vector.multi_reduction <maximumf>, %40, %cst_23 [1] : vector<8x4x128xf32> to vector<8x128xf32>
    %c0_24 = arith.constant 0 : index
    %c0_25 = arith.constant 0 : index
    %42 = vector.load %arg9[%c0_24, %c0_25] : memref<8x128xf32, #tpu.memory_space<vmem>>, vector<8x128xf32>
    tpu.vector_store %arg9[%c0_24, %c0_25], %41 {strides = array<i32>} : memref<8x128xf32, #tpu.memory_space<vmem>>, vector<8x128xf32>,
    return
  }
  func.func @transform_0(%arg0: i32) -> (i32, i32) {
    %c0_i32 = arith.constant 0 : i32
    %c0_i32_0 = arith.constant 0 : i32
    return %arg0, %c0_i32 : i32, i32
  }
  func.func @transform_1(%arg0: i32) -> (i32, i32, i32) {
    %c0_i32 = arith.constant 0 : i32
    %c0_i32_0 = arith.constant 0 : i32
    %c0_i32_1 = arith.constant 0 : i32
    return %arg0, %c0_i32, %c0_i32_0 : i32, i32, i32
  }
  func.func @transform_2(%arg0: i32) -> (i32, i32) {
    %c0_i32 = arith.constant 0 : i32
    %c0_i32_0 = arith.constant 0 : i32
    %c0_i32_1 = arith.constant 0 : i32
    return %c0_i32, %c0_i32_0 : i32, i32
  }
  func.func @transform_3(%arg0: i32) -> (i32, i32) {
    %c0_i32 = arith.constant 0 : i32
    %c0_i32_0 = arith.constant 0 : i32
    %c0_i32_1 = arith.constant 0 : i32
    return %c0_i32, %c0_i32_0 : i32, i32
  }
  func.func @transform_4(%arg0: i32) -> (i32, i32) {
    %c0_i32 = arith.constant 0 : i32
    %c0_i32_0 = arith.constant 0 : i32
    %c0_i32_1 = arith.constant 0 : i32
    return %c0_i32, %c0_i32_0 : i32, i32
  }
  func.func @transform_5(%arg0: i32) -> (i32, i32, i32) {
    %c0_i32 = arith.constant 0 : i32
    %c0_i32_0 = arith.constant 0 : i32
    %c0_i32_1 = arith.constant 0 : i32
    return %arg0, %c0_i32, %c0_i32_0 : i32, i32, i32
  }
  func.func @transform_6(%arg0: i32) -> (i32, i32, i32) {
    %c0_i32 = arith.constant 0 : i32
    %c0_i32_0 = arith.constant 0 : i32
    %c0_i32_1 = arith.constant 0 : i32
    return %arg0, %c0_i32, %c0_i32_0 : i32, i32, i32
  }
  func.func @transform_7(%arg0: i32) -> (i32, i32) {
    %c0_i32 = arith.constant 0 : i32
    %c0_i32_0 = arith.constant 0 : i32
    return %arg0, %c0_i32 : i32, i32
  }
  func.func @transform_8(%arg0: i32) -> (i32, i32) {
    %c0_i32 = arith.constant 0 : i32
    %c0_i32_0 = arith.constant 0 : i32
    return %arg0, %c0_i32 : i32, i32
  }
}

</mosaic_0001>

<bundles_post_ra>
// kernel: tpu_custom_call.1
= control target key start
LH: loop header
LB: loop body
LE: loop exit
PB: predicated region body
PF: predicated region fallthrough
CT: control target
= control target key end

     0   :  { %14 = vsyncpa [#allocation3], 0  ;;  %s1613_s0 = inlined_call_operand.vmem [shape: f32[128,128], index: 0, kind: input, shape index: {}]   ;;  %s1614_s1 = inlined_call_operand.vmem [shape: f32[8,16,1], index: 1, kind: input, shape index: {}]   ;;  %s1615_s2 = inlined_call_operand.hbm [shape: f32[128,128], index: 2, kind: input, shape index: {}]   ;;  %s1616_s3 = inlined_call_operand.vmem [shape: f32[1,128], index: 3, kind: input, shape index: {}]   ;;  %s1617_s4 = inlined_call_operand.vmem [shape: f32[1,128], index: 4, kind: input, shape index: {}]   ;;  %s1618_s5 = inlined_call_operand.vmem [shape: s32[8,4,1], index: 5, kind: input, shape index: {}]   ;;  %s1619_s6 = inlined_call_operand.vmem [shape: s32[8,1,128], index: 6, kind: input, shape index: {}]   ;;  %s1620_s7 = inlined_call_operand.hbm [shape: f32[8,128], index: 7, kind: output, shape index: {0}]   ;;  %s1621_s8 = inlined_call_operand.hbm [shape: f32[8,128], index: 8, kind: output, shape index: {1}]  }
   0x1   :  { %15 = vsyncpa [#allocation4], 0 }
   0x2   :  { %16 = vsyncpa [#allocation7], 0  ;;  %s1191_s27 = smov [#allocation2]  }
   0x3   :  { %s26_s28 = sshll.u32 %s1191_s27, 4  ;;  %s27_s28 = int_to_ptr.vmem [resolvable:$true] %s26_s28 }
   0x4   :  { %s1133_s29 = scalar_lea.vmem %s27_s28, 2048  ;;  %p1138_p1 = scmp.lt.s32.totalorder %s27_s28, %s27_s28 }
   0x5   :  { %p1134_p0 = scmp.ne.s32.totalorder %s27_s28, %s1133_s29  ;;  %p1139_p2 = scmp.lt.s32.totalorder %s1133_s29, %s1133_s29 }
   0x7   :  { %p1140_p3 = por %p1139_p2, %p1138_p1 }
   0x9   :  { %p1141_p4 = pnand %p1140_p3, %p1134_p0 }
   0xb   :  { %1144 = shalt.err (!%p1141_p4)
}
   0xc   :  { %s1192_s30 = smov 128   ;;  %s1193_s9 = smov 8  }
   0xd   :  { %32 = dma.hbm_to_vmem [thread:$0]  %s1615_s2, 2048, %s27_s28, [#allocation3], %s1192_s30, %s1192_s30, %s1193_s9  }
   0xe   :  { %1185 = dma.done.wait [#allocation3], 2048  }
   0xf   :  { %1186 = vsyncadd [#allocation3], 4294965248  ;;  %v75_v0 = vld [vmem:[#allocation2 + $0x78] sm:$0xff]  ;;  %v74_v1 = vld [vmem:[#allocation2 + $0x70] sm:$0xff]  ;;  %vm412_vm5 = vcmask 7168   ;;  %vm827_vm12 = vcmask 1043456  }
  0x10   :  { %980 = vmatprep.subr.mxu0 %v75_v0  ;;  %1036 = vmatprep.subr.mxu1 %v75_v0  ;;  %v73_v2 = vld [vmem:[#allocation2 + $0x68] sm:$0xff]  ;;  %v72_v3 = vld [vmem:[#allocation2 + $0x60] sm:$0xff]  ;;  %v71_v4 = vld [vmem:[#allocation2 + $0x58] sm:$0xff]  ;;  %vm693_vm15 = vcmask 1041409   ;;  %s1197_s2 = smov [#allocation5]  }
  0x11   :  { %981 = vmatpush3.msra.mxu0 %v75_v0  ;;  %1052 = vmatpush3.msra.mxu1 %v75_v0  ;;  %v70_v5 = vld [vmem:[#allocation2 + $0x50] sm:$0xff]  ;;  %v69_v6 = vld [vmem:[#allocation2 + $0x48] sm:$0xff]  ;;  %v68_v7 = vld [vmem:[#allocation2 + $0x40] sm:$0xff]  ;;  %s907_s12 = sshll.u32 %s1197_s2, 4  ;;  %s908_s12 = int_to_ptr.vmem [resolvable:$true] %s907_s12 }
  0x12   :  { %982 = vmatprep.subr.mxu0 %v74_v1  ;;  %1037 = vmatprep.subr.mxu1 %v74_v1  ;;  %v67_v8 = vld [vmem:[#allocation2 + $0x38] sm:$0xff]  ;;  %v66_v9 = vld [vmem:[#allocation2 + $0x30] sm:$0xff]  ;;  %v65_v10 = vld [vmem:[#allocation2 + $0x28] sm:$0xff] }
  0x13   :  { %983 = vmatpush3.msra.mxu0 %v74_v1  ;;  %1053 = vmatpush3.msra.mxu1 %v74_v1  ;;  %v64_v11 = vld [vmem:[#allocation2 + $0x20] sm:$0xff]  ;;  %v63_v12 = vld [vmem:[#allocation2 + $0x18] sm:$0xff]  ;;  %v62_v13 = vld [vmem:[#allocation2 + $0x10] sm:$0xff] }
  0x14   :  { %984 = vmatprep.subr.mxu0 %v73_v2  ;;  %1038 = vmatprep.subr.mxu1 %v73_v2  ;;  %v61_v14 = vld [vmem:[#allocation2 + $0x8] sm:$0xff]  ;;  %v60_v15 = vld [vmem:[#allocation2] sm:$0xff]  ;;  %v46_v19 = vld [vmem:[%s1613_s0 + $0x10] sm:$0xff] }
  0x15   :  { %985 = vmatpush3.msra.mxu0 %v73_v2  ;;  %1054 = vmatpush3.msra.mxu1 %v73_v2  ;;  %v44_v16 = vld [vmem:[%s1613_s0] sm:$0xff]  ;;  %v45_v17 = vld [vmem:[%s1613_s0 + $0x8] sm:$0xff]  ;;  %v54_v21 = vld [vmem:[%s1613_s0 + $0x50] sm:$0xff]  ;;  %v1194_v2 = vmov 0  }
  0x16   :  { %986 = vmatprep.subr.mxu0 %v72_v3  ;;  %1039 = vmatprep.subr.mxu1 %v72_v3  ;;  %v52_v18 = vld [vmem:[%s1613_s0 + $0x40] sm:$0xff]  ;;  %v53_v20 = vld [vmem:[%s1613_s0 + $0x48] sm:$0xff]  ;;  %v47_v22 = vld [vmem:[%s1613_s0 + $0x18] sm:$0xff] }
  0x17   :  { %987 = vmatpush3.msra.mxu0 %v72_v3  ;;  %1055 = vmatpush3.msra.mxu1 %v72_v3  ;;  %v48_v23 = vld [vmem:[%s1613_s0 + $0x20] sm:$0xff]  ;;  %v55_v24 = vld [vmem:[%s1613_s0 + $0x58] sm:$0xff]  ;;  %v49_v26 = vld [vmem:[%s1613_s0 + $0x28] sm:$0xff] }
  0x18   :  { %988 = vmatprep.subr.mxu0 %v71_v4  ;;  %1040 = vmatprep.subr.mxu1 %v71_v4  ;;  %v56_v25 = vld [vmem:[%s1613_s0 + $0x60] sm:$0xff]  ;;  %v50_v27 = vld [vmem:[%s1613_s0 + $0x30] sm:$0xff]  ;;  %v57_v28 = vld [vmem:[%s1613_s0 + $0x68] sm:$0xff] }
  0x19   :  { %989 = vmatpush3.msra.mxu0 %v71_v4  ;;  %1056 = vmatpush3.msra.mxu1 %v71_v4  ;;  %v58_v29 = vld [vmem:[%s1613_s0 + $0x70] sm:$0xff]  ;;  %v51_v30 = vld [vmem:[%s1613_s0 + $0x38] sm:$0xff]  ;;  %v930_v32 = vld [vmem:[%s1617_s4] ss:$0 sm:$0xff] }
  0x1a   :  { %990 = vmatprep.subr.mxu0 %v70_v5  ;;  %1041 = vmatprep.subr.mxu1 %v70_v5  ;;  %v59_v31 = vld [vmem:[%s1613_s0 + $0x78] sm:$0xff]  ;;  %v715_v1 = vld [vmem:[%s1618_s5] sm:$0xf]  ;;  %v716_v4 = vld [vmem:[%s1618_s5 + $0x4] sm:$0xf] }
  0x1b   :  { %991 = vmatpush3.msra.mxu0 %v70_v5  ;;  %1057 = vmatpush3.msra.mxu1 %v70_v5  ;;  %vm723_vm0 = vcmp.eq.s32.totalorder %v715_v1, 0  ;;  %vm724_vm1 = vcmp.eq.s32.totalorder %v716_v4, 0  ;;  %v717_v5 = vld [vmem:[%s1618_s5 + $0x8] sm:$0xf] }
  0x1c   :  { %992 = vmatprep.subr.mxu0 %v69_v6  ;;  %1042 = vmatprep.subr.mxu1 %v69_v6  ;;  %v731_v3 = vsel %vm723_vm0, 1, %v715_v1  ;;  %vm725_vm2 = vcmp.eq.s32.totalorder %v717_v5, 0  ;;  %vm696_vm0 = vcmask 1042434  }
  0x1d   :  { %993 = vmatpush3.msra.mxu0 %v69_v6  ;;  %1058 = vmatpush3.msra.mxu1 %v69_v6  ;;  %v718_v6 = vld [vmem:[%s1618_s5 + $0xc] sm:$0xf] }
  0x1e   :  { %994 = vmatprep.subr.mxu0 %v68_v7  ;;  %1043 = vmatprep.subr.mxu1 %v68_v7  ;;  %vm726_vm3 = vcmp.eq.s32.totalorder %v718_v6, 0 }
  0x1f   :  { %995 = vmatpush3.msra.mxu0 %v68_v7  ;;  %1059 = vmatpush3.msra.mxu1 %v68_v7  ;;  %v732_v7 = vsel %vm724_vm1, 1, %v716_v4 }
  0x20   :  { %996 = vmatprep.subr.mxu0 %v67_v8  ;;  %1044 = vmatprep.subr.mxu1 %v67_v8 }
  0x21   :  { %997 = vmatpush3.msra.mxu0 %v67_v8  ;;  %1060 = vmatpush3.msra.mxu1 %v67_v8  ;;  %v719_v8 = vld [vmem:[%s1618_s5 + $0x10] sm:$0xf] }
  0x22   :  { %998 = vmatprep.subr.mxu0 %v66_v9  ;;  %1045 = vmatprep.subr.mxu1 %v66_v9  ;;  %vm727_vm4 = vcmp.eq.s32.totalorder %v719_v8, 0 }
  0x23   :  { %999 = vmatpush3.msra.mxu0 %v66_v9  ;;  %1061 = vmatpush3.msra.mxu1 %v66_v9  ;;  %v733_v9 = vsel %vm725_vm2, 1, %v717_v5 }
  0x24   :  { %1000 = vmatprep.subr.mxu0 %v65_v10  ;;  %1046 = vmatprep.subr.mxu1 %v65_v10 }
  0x25   :  { %1001 = vmatpush3.msra.mxu0 %v65_v10  ;;  %1062 = vmatpush3.msra.mxu1 %v65_v10  ;;  %v734_v10 = vsel %vm726_vm3, 1, %v718_v6  ;;  %vm699_vm3 = vcmask 1043459  }
  0x26   :  { %1002 = vmatprep.subr.mxu0 %v64_v11  ;;  %1047 = vmatprep.subr.mxu1 %v64_v11 }
  0x27   :  { %1003 = vmatpush3.msra.mxu0 %v64_v11  ;;  %1063 = vmatpush3.msra.mxu1 %v64_v11  ;;  %v735_v11 = vsel %vm727_vm4, 1, %v719_v8  ;;  %vm702_vm4 = vcmask 1044484  }
  0x28   :  { %1004 = vmatprep.subr.mxu0 %v63_v12  ;;  %1048 = vmatprep.subr.mxu1 %v63_v12 }
  0x29   :  { %1005 = vmatpush3.msra.mxu0 %v63_v12  ;;  %1064 = vmatpush3.msra.mxu1 %v63_v12 }
  0x2a   :  { %1006 = vmatprep.subr.mxu0 %v62_v13  ;;  %1049 = vmatprep.subr.mxu1 %v62_v13 }
  0x2b   :  { %1007 = vmatpush3.msra.mxu0 %v62_v13  ;;  %1065 = vmatpush3.msra.mxu1 %v62_v13 }
  0x2c   :  { %1008 = vmatprep.subr.mxu0 %v61_v14  ;;  %1050 = vmatprep.subr.mxu1 %v61_v14 }
  0x2d   :  { %1009 = vmatpush3.msra.mxu0 %v61_v14  ;;  %1066 = vmatpush3.msra.mxu1 %v61_v14 }
  0x2e   :  { %1010 = vmatprep.subr.mxu0 %v60_v15  ;;  %1012 = vmatprep.mubr.f32.mxu0 %v44_v16 }
  0x2f   :  { %1011 = vmatpush3.msra.mxu0 %v60_v15  ;;  %1051 = vmatprep.subr.mxu1 %v60_v15 }
  0x30   :  { %1013 = vmatmul.mubr.f32.vlgmr.msra.gmra.mxu0 %v45_v17  ;;  %1067 = vmatpush3.msra.mxu1 %v60_v15 }
  0x31   :  { %1024 = vmatprep.mubr.f32.mxu1 %v52_v18  ;;  %1015 = vmatprep.mubr.f32.mxu0 %v46_v19 }
  0x32   :  { %1025 = vmatmul.mubr.f32.vlgmr.msra.gmra.mxu1 %v53_v20  ;;  %1075 = vset.pattern.permute.xlu1 %v1194_v2 }
  0x33   :  { %1027 = vmatprep.mubr.f32.mxu1 %v54_v21  ;;  %1076 = vset.pattern.permute.xlu0 %v1194_v2 }
  0x34   :  { %1016 = vmatmul.mubr.f32.gmra.mxu0 %v47_v22 }
  0x35   :  { %1018 = vmatprep.mubr.f32.mxu0 %v48_v23 }
  0x36   :  { %1028 = vmatmul.mubr.f32.gmra.mxu1 %v55_v24 }
  0x37   :  { %1030 = vmatprep.mubr.f32.mxu1 %v56_v25 }
  0x38   :  { %1019 = vmatmul.mubr.f32.gmra.mxu0 %v49_v26 }
  0x39   :  { %1021 = vmatprep.mubr.f32.mxu0 %v50_v27 }
  0x3a   :  { %1031 = vmatmul.mubr.f32.gmra.mxu1 %v57_v28 }
  0x3b   :  { %1033 = vmatprep.mubr.f32.mxu1 %v58_v29 }
  0x3c   :  { %1022 = vmatmul.mubr.f32.gmra.mxu0 %v51_v30 }
  0x3e   :  { %1034 = vmatmul.mubr.f32.gmra.mxu1 %v59_v31 }
  0xf0   :  { %v1297_v33 = vpop.f32.mrf.mxu0 }
  0xf1   :  { %v229_v34 = vmul.f32 %v1297_v33, %v930_v32 }
  0xf2   :  { %v1300_v35 = vpop.f32.mrf.mxu0  ;;  %v1302_v36 = vpop.f32.mrf.mxu1 }
  0xf3   :  { %246 = vadd.xlane.f32.xlu1 %v229_v34  ;;  %v228_v37 = vmul.f32 %v930_v32, %v1300_v35  ;;  %v237_v38 = vmul.f32 %v1302_v36, %v930_v32 }
  0xf4   :  { %v1306_v39 = vpop.f32.mrf.mxu1  ;;  %v1308_v40 = vpop.f32.mrf.mxu0 }
  0xf5   :  { %244 = vadd.xlane.f32.xlu0 %v228_v37  ;;  %v236_v43 = vmul.f32 %v930_v32, %v1306_v39  ;;  %v231_v47 = vmul.f32 %v1308_v40, %v930_v32 }
  0xf6   :  { %v1310_v41 = vpop.f32.mrf.mxu1  ;;  %v1312_v42 = vpop.f32.mrf.mxu0 }
  0xf7   :  { %262 = vadd.xlane.f32.xlu1 %v237_v38  ;;  %v239_v44 = vmul.f32 %v1310_v41, %v930_v32  ;;  %v230_v50 = vmul.f32 %v930_v32, %v1312_v42 }
  0xf8   :  { %v1316_v45 = vpop.f32.mrf.mxu0  ;;  %v1318_v46 = vpop.f32.mrf.mxu1 }
  0xf9   :  { %260 = vadd.xlane.f32.xlu0 %v236_v43  ;;  %v233_v48 = vmul.f32 %v1316_v45, %v930_v32  ;;  %v238_v55 = vmul.f32 %v930_v32, %v1318_v46 }
  0xfa   :  { %v1322_v49 = vpop.f32.mrf.mxu1  ;;  %v1326_v52 = vpop.f32.mrf.mxu0 }
  0xfb   :  { %266 = vadd.xlane.f32.xlu1 %v239_v44  ;;  %v241_v51 = vmul.f32 %v1322_v49, %v930_v32  ;;  %v232_v56 = vmul.f32 %v930_v32, %v1326_v52 }
  0xfc   :  { %v1328_v53 = vpop.f32.mrf.mxu1  ;;  %v1330_v54 = vpop.f32.mrf.mxu0 }
  0xfd   :  { %250 = vadd.xlane.f32.xlu0 %v231_v47  ;;  %v240_v57 = vmul.f32 %v930_v32, %v1328_v53  ;;  %v235_v60 = vmul.f32 %v1330_v54, %v930_v32 }
  0xfe   :  { %v1335_v58 = vpop.f32.mrf.mxu0  ;;  %v1337_v59 = vpop.f32.mrf.mxu1 }
  0xff   :  { %254 = vadd.xlane.f32.xlu1 %v233_v48  ;;  %v234_v61 = vmul.f32 %v930_v32, %v1335_v58  ;;  %v243_v63 = vmul.f32 %v1337_v59, %v930_v32 }
 0x100   :  { %v1341_v62 = vpop.f32.mrf.mxu1 }
 0x101   :  { %248 = vadd.xlane.f32.xlu0 %v230_v50  ;;  %v242_v0 = vmul.f32 %v930_v32, %v1341_v62 }
 0x103   :  { %270 = vadd.xlane.f32.xlu1 %v241_v51 }
 0x105   :  { %264 = vadd.xlane.f32.xlu0 %v238_v55 }
 0x107   :  { %252 = vadd.xlane.f32.xlu1 %v232_v56 }
 0x109   :  { %268 = vadd.xlane.f32.xlu0 %v240_v57 }
 0x10b   :  { %258 = vadd.xlane.f32.xlu1 %v235_v60 }
 0x10d   :  { %256 = vadd.xlane.f32.xlu0 %v234_v61 }
 0x10f   :  { %274 = vadd.xlane.f32.xlu1 %v243_v63 }
 0x111   :  { %272 = vadd.xlane.f32.xlu0 %v242_v0 }
 0x120   :  { %780 = vperm.xlu1 %1075, %v731_v3  }
 0x124   :  { %786 = vperm.xlu1 %1075, %v733_v9  }
 0x127   :  { %783 = vperm.xlu0 %1076, %v732_v7  }
 0x128   :  { %792 = vperm.xlu1 %1075, %v735_v11  }
 0x12b   :  { %789 = vperm.xlu0 %1076, %v734_v10  }
 0x17c   :  { %v247_v12 = vpop.xlane.xlu1 %246 }
 0x17e   :  { %v245_v13 = vpop.xlane.xlu0 %244 }
 0x17f   :  { %v292_v14 = vmax.f32 %v245_v13, %v247_v12 }
 0x180   :  { %v263_v15 = vpop.xlane.xlu1 %262 }
 0x181   :  { %v293_v16 = vrot.slane %v292_v14, 4 }
 0x182   :  { %v261_v17 = vpop.xlane.xlu0 %260 }
 0x183   :  { %v294_v18 = vmax.f32 %v292_v14, %v293_v16  ;;  %v320_v19 = vmax.f32 %v261_v17, %v263_v15 }
 0x184   :  { %v1360_v20 = vpop.xlane.xlu1 %266 }
 0x185   :  { %v295_v21 = vrot.slane %v294_v18, 2  ;;  %v321_v22 = vrot.slane %v320_v19, 4 }
 0x186   :  { %v251_v23 = vpop.xlane.xlu0 %250 }
 0x187   :  { %v296_v24 = vmax.f32 %v294_v18, %v295_v21  ;;  %v322_v25 = vmax.f32 %v320_v19, %v321_v22 }
 0x188   :  { %v1362_v26 = vpop.xlane.xlu1 %254 }
 0x189   :  { %v297_v27 = vrot.slane %v296_v24, 1  ;;  %v323_v28 = vrot.slane %v322_v25, 2 }
 0x18a   :  { %v249_v29 = vpop.xlane.xlu0 %248 }
 0x18b   :  { %v298_v30 = vmax.f32 %v296_v24, %v297_v27  ;;  %v324_v31 = vmax.f32 %v322_v25, %v323_v28  ;;  %v299_v32 = vmax.f32 %v249_v29, %v251_v23 }
 0x18c   :  { %v1364_v34 = vpop.xlane.xlu1 %270 }
 0x18d   :  { %v348_v37 = vsub.f32 %v245_v13, %v298_v30  ;;  %v349_v38 = vsub.f32 %v247_v12, %v298_v30  ;;  %v325_v43 = vrot.slane %v324_v31, 1  ;;  %v300_v44 = vrot.slane %v299_v32, 4 }
 0x18e   :  { %v1366_v47 = vpop.xlane.xlu0 %264 }
 0x18f   :  { %v364_v48 = vmul.f32 1.442695, %v348_v37  ;;  %v366_v50 = vmul.f32 1.442695, %v349_v38  ;;  %v326_v51 = vmax.f32 %v324_v31, %v325_v43  ;;  %v301_v55 = vmax.f32 %v299_v32, %v300_v44 }
 0x190   :  { %v327_v56 = vmax.f32 %v1366_v47, %v1360_v20  ;;  %v1370_v57 = vpop.xlane.xlu1 %252 }
 0x191   :  { %1077 = vpow2.f32 %v364_v48  ;;  %v356_v60 = vsub.f32 %v261_v17, %v326_v51  ;;  %v357_v61 = vsub.f32 %v263_v15, %v326_v51  ;;  %v302_v63 = vrot.slane %v301_v55, 2 }
 0x192   :  { %1079 = vpow2.f32 %v366_v50  ;;  %v328_v0 = vrot.slane %v327_v56, 4  ;;  %v306_v1 = vmax.f32 %v1370_v57, %v1362_v26  ;;  %v1374_v2 = vpop.xlane.xlu0 %268 }
 0x193   :  { %v380_v3 = vmul.f32 1.442695, %v356_v60  ;;  %v382_v4 = vmul.f32 1.442695, %v357_v61  ;;  %v303_v5 = vmax.f32 %v301_v55, %v302_v63  ;;  %v334_v6 = vmax.f32 %v1374_v2, %v1364_v34 }
 0x194   :  { %v329_v7 = vmax.f32 %v327_v56, %v328_v0  ;;  %v307_v8 = vrot.slane %v306_v1, 4  ;;  %v1378_v9 = vpop.xlane.xlu1 %258 }
 0x195   :  { %1081 = vpow2.f32 %v380_v3  ;;  %v304_v10 = vrot.slane %v303_v5, 1  ;;  %v335_v11 = vrot.slane %v334_v6, 4 }
 0x196   :  { %1083 = vpow2.f32 %v382_v4  ;;  %v330_v12 = vrot.slane %v329_v7, 2  ;;  %v308_v13 = vmax.f32 %v306_v1, %v307_v8  ;;  %v1380_v14 = vpop.xlane.xlu0 %256  ;;  %v277_v4 = vld [vmem:[%s1614_s1 + $0x8] sm:$0xff] }
 0x197   :  { %v305_v15 = vmax.f32 %v303_v5, %v304_v10  ;;  %v336_v16 = vmax.f32 %v334_v6, %v335_v11  ;;  %v313_v17 = vmax.f32 %v1380_v14, %v1378_v9 }
 0x198   :  { %v331_v18 = vmax.f32 %v329_v7, %v330_v12  ;;  %v309_v19 = vrot.slane %v308_v13, 2  ;;  %v1384_v27 = vpop.xlane.xlu1 %274 }
 0x199   :  { %v350_v21 = vsub.f32 %v249_v29, %v305_v15  ;;  %v351_v22 = vsub.f32 %v251_v23, %v305_v15  ;;  %v337_v24 = vrot.slane %v336_v16, 2  ;;  %v314_v25 = vrot.slane %v313_v17, 4  ;;  %v276_v23 = vld [vmem:[%s1614_s1] sm:$0xff] }
 0x19a   :  { %v332_v28 = vrot.slane %v331_v18, 1  ;;  %v310_v30 = vmax.f32 %v308_v13, %v309_v19  ;;  %v1386_v31 = vpop.xlane.xlu0 %272 }
 0x19b   :  { %v368_v32 = vmul.f32 1.442695, %v350_v21  ;;  %v370_v37 = vmul.f32 1.442695, %v351_v22  ;;  %v338_v38 = vmax.f32 %v336_v16, %v337_v24  ;;  %v315_v43 = vmax.f32 %v313_v17, %v314_v25 }
 0x19c   :  { %v333_v44 = vmax.f32 %v331_v18, %v332_v28  ;;  %v311_v48 = vrot.slane %v310_v30, 1  ;;  %v341_v50 = vmax.f32 %v1386_v31, %v1384_v27 }
 0x19d   :  { %1085 = vpow2.f32 %v368_v32  ;;  %v339_v29 = vrot.slane %v338_v38, 1  ;;  %v316_v51 = vrot.slane %v315_v43, 2 }
 0x19e   :  { %v1078_v55 = vpop.eup %1077  ;;  %1087 = vpow2.f32 %v370_v37  ;;  %v358_v56 = vsub.f32 %v1366_v47, %v333_v44  ;;  %v359_v60 = vsub.f32 %v1360_v20, %v333_v44  ;;  %v312_v61 = vmax.f32 %v310_v30, %v311_v48 }
 0x19f   :  { %v1080_v63 = vpop.eup %1079  ;;  %v340_v0 = vmax.f32 %v338_v38, %v339_v29  ;;  %v317_v1 = vmax.f32 %v315_v43, %v316_v51  ;;  %v342_v3 = vrot.slane %v341_v50, 4  ;;  %v1398_v5 = vmul.f32 %v1078_v55, %v276_v23  ;;  %v279_v55 = vld [vmem:[%s1614_s1 + $0x18] sm:$0xff] }
 0x1a0   :  { %v384_v6 = vmul.f32 1.442695, %v358_v56  ;;  %v386_v7 = vmul.f32 1.442695, %v359_v60  ;;  %v352_v8 = vsub.f32 %v1370_v57, %v312_v61  ;;  %v353_v10 = vsub.f32 %v1362_v26, %v312_v61  ;;  %v284_v26 = vld [vmem:[%s1614_s1 + $0x40] sm:$0xff] }
 0x1a1   :  { %v360_v47 = vsub.f32 %v1374_v2, %v340_v0  ;;  %v361_v20 = vsub.f32 %v1364_v34, %v340_v0  ;;  %v318_v11 = vrot.slane %v317_v1, 1  ;;  %v343_v12 = vmax.f32 %v341_v50, %v342_v3  ;;  %v285_v34 = vld [vmem:[%s1614_s1 + $0x48] sm:$0xff] }
 0x1a2   :  { %v1082_v13 = vpop.eup %1081  ;;  %1089 = vpow2.f32 %v384_v6  ;;  %v372_v15 = vmul.f32 1.442695, %v352_v8  ;;  %v374_v16 = vmul.f32 1.442695, %v353_v10  ;;  %v1404_v17 = vmul.f32 %v1080_v63, %v277_v4 }
 0x1a3   :  { %v1084_v18 = vpop.eup %1083  ;;  %1091 = vpow2.f32 %v386_v7  ;;  %v388_v19 = vmul.f32 1.442695, %v360_v47  ;;  %v390_v21 = vmul.f32 1.442695, %v361_v20  ;;  %v319_v22 = vmax.f32 %v317_v1, %v318_v11  ;;  %v286_v47 = vld [vmem:[%s1614_s1 + $0x50] sm:$0xff] }
 0x1a4   :  { %1093 = vpow2.f32 %v372_v15  ;;  %v344_v57 = vrot.slane %v343_v12, 2  ;;  %v413_v2 = vsel %vm412_vm5, %v1398_v5, 0.0  ;;  %v414_v24 = vsel %vm412_vm5, %v1404_v17, 0.0 }
 0x1a5   :  { %1095 = vpow2.f32 %v374_v16  ;;  %v354_v25 = vsub.f32 %v1380_v14, %v319_v22  ;;  %v355_v28 = vsub.f32 %v1378_v9, %v319_v22  ;;  %v415_v30 = vadd.f32 %v414_v24, %v413_v2  ;;  %v278_v9 = vld [vmem:[%s1614_s1 + $0x10] sm:$0xff]  ;;  %v287_v16 = vld [vmem:[%s1614_s1 + $0x58] sm:$0xff]  ;;  %v281_v22 = vld [vmem:[%s1614_s1 + $0x28] sm:$0xff] }
 0x1a6   :  { %1097 = vpow2.f32 %v388_v19  ;;  %v345_v32 = vmax.f32 %v343_v12, %v344_v57  ;;  %v1418_v37 = vmul.f32 %v1082_v13, %v284_v26  ;;  %v1420_v38 = vmul.f32 %v1084_v18, %v285_v34  ;;  %v280_v18 = vld [vmem:[%s1614_s1 + $0x20] sm:$0xff] }
 0x1a7   :  { %1099 = vpow2.f32 %v390_v21  ;;  %v376_v43 = vmul.f32 1.442695, %v354_v25  ;;  %v378_v44 = vmul.f32 1.442695, %v355_v28  ;;  %v416_v48 = vrot.slane %v415_v30, 4  ;;  %v288_v24 = vld [vmem:[%s1614_s1 + $0x60] sm:$0xff] }
 0x1a8   :  { %v346_v50 = vrot.slane %v345_v32, 1  ;;  %v449_v23 = vsel %vm412_vm5, %v1418_v37, 0.0  ;;  %v450_v14 = vsel %vm412_vm5, %v1420_v38, 0.0 }
 0x1a9   :  { %1101 = vpow2.f32 %v376_v43  ;;  %v417_v29 = vadd.f32 %v416_v48, %v415_v30  ;;  %v451_v51 = vadd.f32 %v450_v14, %v449_v23  ;;  %v289_v23 = vld [vmem:[%s1614_s1 + $0x68] sm:$0xff] }
 0x1aa   :  { %v1086_v56 = vpop.eup %1085  ;;  %1103 = vpow2.f32 %v378_v44  ;;  %v347_v60 = vmax.f32 %v345_v32, %v346_v50 }
 0x1ab   :  { %v1088_v61 = vpop.eup %1087  ;;  %v418_v63 = vrot.slane %v417_v29, 2  ;;  %v452_v0 = vrot.slane %v451_v51, 4  ;;  %v1432_v1 = vmul.f32 %v1086_v56, %v278_v9 }
 0x1ac   :  { %v362_v3 = vsub.f32 %v1386_v31, %v347_v60  ;;  %v363_v4 = vsub.f32 %v1384_v27, %v347_v60  ;;  %v1436_v6 = vmul.f32 %v1088_v61, %v279_v55 }
 0x1ad   :  { %v419_v7 = vadd.f32 %v418_v63, %v417_v29  ;;  %v453_v8 = vadd.f32 %v452_v0, %v451_v51  ;;  %v422_v10 = vsel %vm412_vm5, %v1432_v1, 0.0  ;;  %v282_v63 = vld [vmem:[%s1614_s1 + $0x30] sm:$0xff]  ;;  %v283_v0 = vld [vmem:[%s1614_s1 + $0x38] sm:$0xff] }
 0x1ae   :  { %v392_v20 = vmul.f32 1.442695, %v362_v3  ;;  %v394_v11 = vmul.f32 1.442695, %v363_v4  ;;  %v423_v12 = vsel %vm412_vm5, %v1436_v6, 0.0 }
 0x1af   :  { %v1090_v13 = vpop.eup %1089  ;;  %v420_v31 = vrot.slane %v419_v7, 1  ;;  %v454_v15 = vrot.slane %v453_v8, 2  ;;  %v424_v27 = vadd.f32 %v423_v12, %v422_v10 }
 0x1b0   :  { %v1092_v19 = vpop.eup %1091  ;;  %1105 = vpow2.f32 %v392_v20  ;;  %v1451_v21 = vmul.f32 %v1090_v13, %v286_v47 }
 0x1b1   :  { %v1094_v26 = vpop.eup %1093  ;;  %1107 = vpow2.f32 %v394_v11  ;;  %v421_v34 = vadd.f32 %v420_v31, %v419_v7  ;;  %v455_v57 = vadd.f32 %v454_v15, %v453_v8  ;;  %v425_v2 = vrot.slane %v424_v27, 4 }
 0x1b2   :  { %v1096_v25 = vpop.eup %1095  ;;  %v1459_v28 = vmul.f32 %v1092_v19, %v287_v16  ;;  %v458_v30 = vsel %vm412_vm5, %v1451_v21, 0.0  ;;  %v1463_v32 = vmul.f32 %v1094_v26, %v280_v18 }
 0x1b3   :  { %v1098_v43 = vpop.eup %1097  ;;  %v485_v44 = vadd.f32 1e-12, %v421_v34  ;;  %v456_v48 = vrot.slane %v455_v57, 1  ;;  %v426_v50 = vadd.f32 %v425_v2, %v424_v27  ;;  %v1468_v14 = vmul.f32 %v1096_v25, %v281_v22 }
 0x1b4   :  { %v1100_v9 = vpop.eup %1099  ;;  %v459_v29 = vsel %vm412_vm5, %v1459_v28, 0.0  ;;  %v1472_v51 = vmul.f32 %v1098_v43, %v288_v24  ;;  %v431_v55 = vsel %vm412_vm5, %v1463_v32, 0.0  ;;  %v290_v24 = vld [vmem:[%s1614_s1 + $0x70] sm:$0xff]  ;;  %v291_v43 = vld [vmem:[%s1614_s1 + $0x78] sm:$0xff] }
 0x1b5   :  { %1109 = vrcp.f32 %v485_v44  ;;  %v457_v56 = vadd.f32 %v456_v48, %v455_v57  ;;  %v427_v60 = vrot.slane %v426_v50, 2  ;;  %v460_v61 = vadd.f32 %v459_v29, %v458_v30 }
 0x1b6   :  { %v1102_v3 = vpop.eup %1101  ;;  %v1482_v4 = vmul.f32 %v1100_v9, %v289_v23  ;;  %v467_v7 = vsel %vm412_vm5, %v1472_v51, 0.0  ;;  %v432_v8 = vsel %vm412_vm5, %v1468_v14, 0.0 }
 0x1b7   :  { %v1104_v10 = vpop.eup %1103  ;;  %v489_v47 = vadd.f32 1e-12, %v457_v56  ;;  %v428_v20 = vadd.f32 %v427_v60, %v426_v50  ;;  %v461_v11 = vrot.slane %v460_v61, 4  ;;  %v433_v12 = vadd.f32 %v432_v8, %v431_v55 }
 0x1b8   :  { %v468_v13 = vsel %vm412_vm5, %v1482_v4, 0.0  ;;  %v1490_v31 = vmul.f32 %v1102_v3, %v282_v63  ;;  %v1492_v15 = vmul.f32 %v1104_v10, %v283_v0 }
 0x1b9   :  { %1111 = vrcp.f32 %v489_v47  ;;  %v429_v27 = vrot.slane %v428_v20, 1  ;;  %v462_v16 = vadd.f32 %v461_v11, %v460_v61  ;;  %v469_v18 = vadd.f32 %v468_v13, %v467_v7 }
 0x1ba   :  { %v434_v19 = vrot.slane %v433_v12, 4  ;;  %v440_v22 = vsel %vm412_vm5, %v1490_v31, 0.0  ;;  %v441_v26 = vsel %vm412_vm5, %v1492_v15, 0.0 }
 0x1bb   :  { %v430_v34 = vadd.f32 %v429_v27, %v428_v20  ;;  %v463_v57 = vrot.slane %v462_v16, 2  ;;  %v470_v2 = vrot.slane %v469_v18, 4  ;;  %v442_v25 = vadd.f32 %v441_v26, %v440_v22 }
 0x1bc   :  { %v435_v30 = vadd.f32 %v434_v19, %v433_v12 }
 0x1bd   :  { %v1106_v44 = vpop.eup %1105  ;;  %v486_v48 = vadd.f32 1e-12, %v430_v34  ;;  %v464_v50 = vadd.f32 %v463_v57, %v462_v16  ;;  %v471_v23 = vadd.f32 %v470_v2, %v469_v18  ;;  %v443_v9 = vrot.slane %v442_v25, 4 }
 0x1be   :  { %v1108_v29 = vpop.eup %1107  ;;  %v436_v55 = vrot.slane %v435_v30, 2  ;;  %v1504_v56 = vmul.f32 %v1106_v44, %v290_v24 }
 0x1bf   :  { %1113 = vrcp.f32 %v486_v48  ;;  %v465_v60 = vrot.slane %v464_v50, 1  ;;  %v472_v61 = vrot.slane %v471_v23, 2  ;;  %v411_v63 = vmul.f32 %v1108_v29, %v291_v43 }
 0x1c0   :  { %v437_v0 = vadd.f32 %v436_v55, %v435_v30  ;;  %v476_v3 = vsel %vm412_vm5, %v1504_v56, 0.0  ;;  %v444_v7 = vadd.f32 %v443_v9, %v442_v25 }
 0x1c1   :  { %v466_v8 = vadd.f32 %v465_v60, %v464_v50  ;;  %v473_v10 = vadd.f32 %v472_v61, %v471_v23  ;;  %v477_v47 = vsel %vm412_vm5, %v411_v63, 0.0 }
 0x1c2   :  { %v1110_v20 = vpop.eup %1109  ;;  %v438_v11 = vrot.slane %v437_v0, 1  ;;  %v478_v12 = vadd.f32 %v477_v47, %v476_v3  ;;  %v445_v13 = vrot.slane %v444_v7, 2  ;;  %v720_v47 = vld [vmem:[%s1618_s5 + $0x14] sm:$0xf] }
 0x1c3   :  { %v495_v27 = vmul.f32 %v1110_v20, %v1404_v17  ;;  %v494_v16 = vmul.f32 %v1110_v20, %v1398_v5  ;;  %v490_v18 = vadd.f32 1e-12, %v466_v8  ;;  %v474_v19 = vrot.slane %v473_v10, 1 }
 0x1c4   :  { %v439_v22 = vadd.f32 %v438_v11, %v437_v0  ;;  %v479_v26 = vrot.slane %v478_v12, 4  ;;  %v446_v57 = vadd.f32 %v445_v13, %v444_v7  ;;  %vm728_vm6 = vcmp.eq.s32.totalorder %v720_v47, 0 }
 0x1c5   :  { %524 = vperm.xlu1 %1075, %v495_v27   ;;  %519 = vperm.xlu0 %1076, %v494_v16   ;;  %1115 = vrcp.f32 %v490_v18  ;;  %v475_v34 = vadd.f32 %v474_v19, %v473_v10  ;;  %v781_v16 = vpop.permute.xlu1 %780  ;;  %v784_v19 = vpop.permute.xlu0 %783 }
 0x1c6   :  { %v1112_v2 = vpop.eup %1111  ;;  %v487_v24 = vadd.f32 1e-12, %v439_v22  ;;  %v480_v25 = vadd.f32 %v479_v26, %v478_v12  ;;  %v447_v5 = vrot.slane %v446_v57, 1  ;;  %v933_v26 = vld [vmem:[%s1619_s6 + $0x1] ss:$0 sm:$0xff] }
 0x1c7   :  { %v506_v30 = vmul.f32 %v1112_v2, %v1418_v37  ;;  %v507_v43 = vmul.f32 %v1112_v2, %v1420_v38  ;;  %v491_v44 = vadd.f32 1e-12, %v475_v34  ;;  %vm804_vm10 = vcmp.eq.s32.totalorder %v933_v26, %v784_v19 }
 0x1c8   :  { %1117 = vrcp.f32 %v487_v24  ;;  %v481_v17 = vrot.slane %v480_v25, 2  ;;  %v448_v29 = vadd.f32 %v447_v5, %v446_v57  ;;  %v1195_v2 = vmov 0.0  }
 0x1c9   :  { %559 = vperm.xlu1 %1075, %v506_v30   ;;  %564 = vperm.xlu0 %1076, %v507_v43   ;;  %1119 = vrcp.f32 %v491_v44  ;;  %v787_v18 = vpop.permute.xlu1 %786  ;;  %v790_v34 = vpop.permute.xlu0 %789 }
 0x1ca   :  { %v482_v48 = vadd.f32 %v481_v17, %v480_v25  ;;  %v488_v61 = vadd.f32 1e-12, %v448_v29  ;;  %v941_v25 = vsel %vm804_vm10, 1.0, %v1195_v2 }
 0x1cb   :  { %v835_v5 = vsel %vm827_vm12, %v941_v25, -inf }
 0x1cc   :  { %v1114_v50 = vpop.eup %1113  ;;  %v483_v23 = vrot.slane %v482_v48, 1 }
 0x1cd   :  { %v497_v9 = vmul.f32 %v1114_v50, %v1432_v1  ;;  %v498_v37 = vmul.f32 %v1114_v50, %v1436_v6 }
 0x1ce   :  { %v484_v55 = vadd.f32 %v483_v23, %v482_v48  ;;  %v935_v48 = vld [vmem:[%s1619_s6 + $0x3] ss:$0 sm:$0xff] }
 0x1cf   :  { %529 = vperm.xlu1 %1075, %v497_v9   ;;  %v836_v9 = vrot.slane %v835_v5, 4  ;;  %vm806_vm13 = vcmp.eq.s32.totalorder %v935_v48, %v790_v34 }
 0x1d0   :  { %v492_v60 = vadd.f32 1e-12, %v484_v55 }
 0x1d2   :  { %v1116_v38 = vpop.eup %1115  ;;  %1121 = vrcp.f32 %v492_v60 }
 0x1d3   :  { %534 = vperm.xlu1 %1075, %v498_v37   ;;  %v510_v0 = vmul.f32 %v1116_v38, %v1459_v28  ;;  %v509_v7 = vmul.f32 %v1116_v38, %v1451_v21  ;;  %1123 = vrcp.f32 %v488_v61  ;;  %v936_v61 = vld [vmem:[%s1619_s6 + $0x4] ss:$0 sm:$0xff] }
 0x1d5   :  { %v1118_v3 = vpop.eup %1117  ;;  %574 = vperm.xlu0 %1076, %v510_v0   ;;  %v837_v0 = vmax.f32 %v835_v5, %v836_v9 }
 0x1d6   :  { %v1120_v8 = vpop.eup %1119  ;;  %v500_v10 = vmul.f32 %v1118_v3, %v1463_v32  ;;  %v501_v6 = vmul.f32 %v1118_v3, %v1468_v14  ;;  %v736_v32 = vsel %vm728_vm6, 1, %v720_v47  ;;  %v943_v3 = vsel %vm806_vm13, 1.0, %v1195_v2 }
 0x1d7   :  { %569 = vperm.xlu1 %1075, %v509_v7   ;;  %v513_v1 = vmul.f32 %v1120_v8, %v1482_v4  ;;  %v512_v21 = vmul.f32 %v1120_v8, %v1472_v51  ;;  %v722_v4 = vld [vmem:[%s1618_s5 + $0x1c] sm:$0xf]  ;;  %v721_v51 = vld [vmem:[%s1618_s5 + $0x18] sm:$0xf]  ;;  %v849_v47 = vsel %vm827_vm12, %v943_v3, -inf  ;;  %vm705_vm6 = vcmask 1045509  }
 0x1d8   :  { %vm730_vm7 = vcmp.eq.s32.totalorder %v722_v4, 0  ;;  %vm729_vm8 = vcmp.eq.s32.totalorder %v721_v51, 0 }
 0x1d9   :  { %584 = vperm.xlu0 %1076, %v513_v1   ;;  %v738_v12 = vsel %vm730_vm7, 1, %v722_v4  ;;  %v737_v27 = vsel %vm729_vm8, 1, %v721_v51  ;;  %vm708_vm7 = vcmask 1046534   ;;  %vm711_vm8 = vcmask 1047559  }
 0x1db   :  { %539 = vperm.xlu1 %1075, %v500_v10  }
 0x1df   :  { %v1122_v28 = vpop.eup %1121  ;;  %544 = vperm.xlu1 %1075, %v501_v6  }
 0x1e0   :  { %v516_v20 = vmul.f32 %v1122_v28, %v411_v63  ;;  %v1124_v11 = vpop.eup %1123  ;;  %v515_v63 = vmul.f32 %v1122_v28, %v1504_v56  ;;  %v934_v56 = vld [vmem:[%s1619_s6 + $0x2] ss:$0 sm:$0xff] }
 0x1e1   :  { %v503_v14 = vmul.f32 %v1124_v11, %v1490_v31  ;;  %v504_v13 = vmul.f32 %v1124_v11, %v1492_v15  ;;  %v793_v31 = vpop.permute.xlu1 %792  ;;  %v932_v15 = vld [vmem:[%s1619_s6] ss:$0 sm:$0xff]  ;;  %vm805_vm11 = vcmp.eq.s32.totalorder %v934_v56, %v787_v18 }
 0x1e2   :  { %594 = vperm.xlu0 %1076, %v516_v20   ;;  %vm803_vm9 = vcmp.eq.s32.totalorder %v932_v15, %v781_v16  ;;  %v942_v43 = vsel %vm805_vm11, 1.0, %v1195_v2  ;;  %vm807_vm14 = vcmp.eq.s32.totalorder %v936_v61, %v793_v31 }
 0x1e3   :  { %579 = vperm.xlu1 %1075, %v512_v21   ;;  %v940_v24 = vsel %vm803_vm9, 1.0, %v1195_v2  ;;  %v842_v50 = vsel %vm827_vm12, %v942_v43, -inf  ;;  %v838_v21 = vrot.slane %v837_v0, 2 }
 0x1e4   :  { %v828_v17 = vsel %vm827_vm12, %v940_v24, -inf  ;;  %v843_v60 = vrot.slane %v842_v50, 4 }
 0x1e5   :  { %v829_v23 = vrot.slane %v828_v17, 4 }
 0x1e6   :  { %795 = vperm.xlu0 %1076, %v736_v32   ;;  %v844_v10 = vmax.f32 %v842_v50, %v843_v60 }
 0x1e7   :  { %549 = vperm.xlu1 %1075, %v503_v14   ;;  %v830_v38 = vmax.f32 %v828_v17, %v829_v23 }
 0x1e9   :  { %v831_v20 = vrot.slane %v830_v38, 2 }
 0x1ea   :  { %801 = vperm.xlu0 %1076, %v738_v12   ;;  %v845_v12 = vrot.slane %v844_v10, 2 }
 0x1eb   :  { %554 = vperm.xlu1 %1075, %v504_v13   ;;  %v850_v13 = vrot.slane %v849_v47, 4  ;;  %v832_v16 = vmax.f32 %v830_v38, %v831_v20 }
 0x1ec   :  { %v846_v15 = vmax.f32 %v844_v10, %v845_v12 }
 0x1ee   :  { %v847_v48 = vrot.slane %v846_v15, 1 }
 0x1ef   :  { %589 = vperm.xlu1 %1075, %v515_v63  }
 0x1f3   :  { %798 = vperm.xlu1 %1075, %v737_v27  }
 0x240   :  { %v525_v22 = vpop.permute.xlu1 %524  ;;  %v520_v30 = vpop.permute.xlu0 %519 }
 0x241   :  { %v598_v28 = vmul.f32 %v1297_v33, %v525_v22 }
 0x244   :  { %v560_v57 = vpop.permute.xlu1 %559  ;;  %v565_v55 = vpop.permute.xlu0 %564 }
 0x245   :  { %v605_v4 = vmul.f32 %v560_v57, %v1306_v39  ;;  %v606_v11 = vmul.f32 %v1302_v36, %v565_v55 }
 0x247   :  { %v641_v31 = vadd.f32 %v606_v11, %v605_v4 }
 0x24a   :  { %v530_v44 = vpop.permute.xlu1 %529 }
 0x24b   :  { %v599_v7 = vmul.f32 %v530_v44, %v1312_v42  ;;  %v944_v42 = vsel %vm807_vm14, 1.0, %v1195_v2 }
 0x24c   :  { %v856_v18 = vsel %vm827_vm12, %v944_v42, -inf }
 0x24d   :  { %v857_v56 = vrot.slane %v856_v18, 4 }
 0x24e   :  { %v535_v29 = vpop.permute.xlu1 %534 }
 0x24f   :  { %v600_v37 = vmul.f32 %v1308_v40, %v535_v29  ;;  %v597_v40 = vmul.f32 %v520_v30, %v1300_v35  ;;  %v839_v35 = vmax.f32 %v837_v0, %v838_v21  ;;  %v642_v30 = vrot.slane %v641_v31, 4 }
 0x250   :  { %v575_v1 = vpop.permute.xlu0 %574  ;;  %v858_v9 = vmax.f32 %v856_v18, %v857_v56 }
 0x251   :  { %v620_v6 = vadd.f32 %v600_v37, %v599_v7  ;;  %v613_v63 = vadd.f32 %v598_v28, %v597_v40  ;;  %v608_v27 = vmul.f32 %v1310_v41, %v575_v1  ;;  %v833_v41 = vrot.slane %v832_v16, 1 }
 0x252   :  { %v570_v8 = vpop.permute.xlu1 %569  ;;  %v840_v25 = vrot.slane %v839_v35, 1  ;;  %v643_v38 = vadd.f32 %v642_v30, %v641_v31  ;;  %v848_v1 = vmax.f32 %v846_v15, %v847_v48  ;;  %v859_v28 = vrot.slane %v858_v9, 2  ;;  %v938_v30 = vld [vmem:[%s1619_s6 + $0x6] ss:$0 sm:$0xff] }
 0x253   :  { %v607_v14 = vmul.f32 %v570_v8, %v1318_v46  ;;  %v621_v51 = vrot.slane %v620_v6, 4  ;;  %v851_v46 = vmax.f32 %v849_v47, %v850_v13  ;;  %v614_v34 = vrot.slane %v613_v63, 4  ;;  %v939_v8 = vld [vmem:[%s1619_s6 + $0x7] ss:$0 sm:$0xff] }
 0x254   :  { %v585_v33 = vpop.permute.xlu0 %584  ;;  %v834_v61 = vmax.f32 %v832_v16, %v833_v41  ;;  %v841_v0 = vmax.f32 %v839_v35, %v840_v25  ;;  %v644_v11 = vrot.slane %v643_v38, 2 }
 0x255   :  { %v648_v19 = vadd.f32 %v608_v27, %v607_v14  ;;  %v622_v26 = vadd.f32 %v621_v51, %v620_v6  ;;  %v610_v17 = vmul.f32 %v1322_v49, %v585_v33  ;;  %v852_v50 = vrot.slane %v851_v46, 2 }
 0x256   :  { %v540_v32 = vpop.permute.xlu1 %539  ;;  %v615_v29 = vadd.f32 %v614_v34, %v613_v63  ;;  %v892_v27 = vsel %vm693_vm15, %v841_v0, %v834_v61 }
 0x257   :  { %v601_v36 = vmul.f32 %v540_v32, %v1326_v52  ;;  %v649_v44 = vrot.slane %v648_v19, 4  ;;  %v623_v23 = vrot.slane %v622_v26, 2  ;;  %v853_v10 = vmax.f32 %v851_v46, %v852_v50 }
 0x258   :  { %v616_v40 = vrot.slane %v615_v29, 2 }
 0x259   :  { %v624_v6 = vadd.f32 %v623_v23, %v622_v26  ;;  %v854_v18 = vrot.slane %v853_v10, 1 }
 0x25a   :  { %v545_v39 = vpop.permute.xlu1 %544  ;;  %v617_v26 = vadd.f32 %v616_v40, %v615_v29 }
 0x25b   :  { %v602_v22 = vmul.f32 %v1316_v45, %v545_v39  ;;  %v937_v45 = vld [vmem:[%s1619_s6 + $0x5] ss:$0 sm:$0xff]  ;;  %v625_v33 = vrot.slane %v624_v6, 1 }
 0x25d   :  { %v627_v57 = vadd.f32 %v602_v22, %v601_v36  ;;  %v1568_v24 = vpop.permute.xlu0 %594  ;;  %v860_v36 = vmax.f32 %v858_v9, %v859_v28  ;;  %v645_v22 = vadd.f32 %v644_v11, %v643_v38  ;;  %v626_v34 = vadd.f32 %v625_v33, %v624_v6 }
 0x25e   :  { %v580_v43 = vpop.permute.xlu1 %579 }
 0x25f   :  { %v628_v5 = vrot.slane %v627_v57, 4  ;;  %v609_v52 = vmul.f32 %v580_v43, %v1328_v53  ;;  %v650_v53 = vadd.f32 %v649_v44, %v648_v19  ;;  %v855_v43 = vmax.f32 %v853_v10, %v854_v18 }
 0x261   :  { %v629_v55 = vadd.f32 %v628_v5, %v627_v57  ;;  %v655_v60 = vadd.f32 %v610_v17, %v609_v52  ;;  %v796_v37 = vpop.permute.xlu0 %795  ;;  %v651_v12 = vrot.slane %v650_v53, 2  ;;  %v612_v57 = vmul.f32 %v1337_v59, %v1568_v24  ;;  %v931_v59 = vld [vmem:[%s1616_s3] ss:$0 sm:$0xff]  ;;  %s1196_s3 = smov [#allocation6]  }
 0x262   :  { %vm808_vm1 = vcmp.eq.s32.totalorder %v937_v45, %v796_v37  ;;  %v550_v49 = vpop.permute.xlu1 %549  ;;  %v861_v52 = vrot.slane %v860_v36, 1  ;;  %v646_v45 = vrot.slane %v645_v22, 1  ;;  %v618_v24 = vrot.slane %v617_v26, 1  ;;  %s917_s6 = sshll.u32 %s1196_s3, 4  ;;  %s918_s6 = int_to_ptr.vmem [resolvable:$true] %s917_s6 }
 0x263   :  { %v630_v3 = vrot.slane %v629_v55, 2  ;;  %v656_v7 = vrot.slane %v655_v60, 4  ;;  %v945_v47 = vsel %vm808_vm1, 1.0, %v1195_v2  ;;  %v603_v13 = vmul.f32 %v550_v49, %v1335_v58  ;;  %s1145_s13 = scalar_lea.vmem %s918_s6, 128  ;;  %p1150_p6 = scmp.lt.s32.totalorder %s918_s6, %s918_s6 }
 0x264   :  { %v863_v21 = vsel %vm827_vm12, %v945_v47, -inf  ;;  %v893_v58 = vsel %vm696_vm0, %v848_v1, %v892_v27  ;;  %v652_v56 = vadd.f32 %v651_v12, %v650_v53  ;;  %v677_v29 = vadd.f32 %v931_v59, %v626_v34  ;;  %p1146_p5 = scmp.ne.s32.totalorder %s918_s6, %s1145_s13  ;;  %p1151_p7 = scmp.lt.s32.totalorder %s1145_s13, %s1145_s13 }
 0x265   :  { %v657_v20 = vadd.f32 %v656_v7, %v655_v60  ;;  %v802_v4 = vpop.permute.xlu0 %801  ;;  %v631_v32 = vadd.f32 %v630_v3, %v629_v55  ;;  %v864_v42 = vrot.slane %v863_v21, 4  ;;  %v647_v53 = vadd.f32 %v646_v45, %v645_v22 }
 0x266   :  { %vm810_vm2 = vcmp.eq.s32.totalorder %v939_v8, %v802_v4  ;;  %v555_v14 = vpop.permute.xlu1 %554  ;;  %v862_v1 = vmax.f32 %v860_v36, %v861_v52  ;;  %v619_v10 = vadd.f32 %v618_v24, %v617_v26  ;;  %v692_v4 = vrot.slane %v677_v29, 7  ;;  %p1152_p8 = por %p1151_p7, %p1150_p6 }
 0x267   :  { %v947_v51 = vsel %vm810_vm2, 1.0, %v1195_v2  ;;  %v604_v63 = vmul.f32 %v1330_v54, %v555_v14  ;;  %v658_v16 = vrot.slane %v657_v20, 2  ;;  %v865_v31 = vmax.f32 %v863_v21, %v864_v42 }
 0x268   :  { %v877_v35 = vsel %vm827_vm12, %v947_v51, -inf  ;;  %v632_v15 = vrot.slane %v631_v32, 1  ;;  %v894_v21 = vsel %vm699_vm3, %v855_v43, %v893_v58  ;;  %v680_v42 = vadd.f32 %v931_v59, %v647_v53  ;;  %p1153_p9 = pnand %p1152_p8, %p1146_p5 }
 0x269   :  { %v878_v39 = vrot.slane %v877_v35, 4  ;;  %v634_v19 = vadd.f32 %v604_v63, %v603_v13  ;;  %v659_v41 = vadd.f32 %v658_v16, %v657_v20  ;;  %v866_v44 = vrot.slane %v865_v31, 2 }
 0x26a   :  { %v590_v46 = vpop.permute.xlu1 %589  ;;  %v633_v48 = vadd.f32 %v632_v15, %v631_v32  ;;  %v676_v51 = vadd.f32 %v931_v59, %v619_v10  ;;  %v895_v33 = vsel %vm702_vm4, %v862_v1, %v894_v21  ;;  %v701_v22 = vrot.slane %v680_v42, 4 }
 0x26b   :  { %v635_v54 = vrot.slane %v634_v19, 4  ;;  %v611_v25 = vmul.f32 %v590_v46, %v1341_v62  ;;  %v879_v17 = vmax.f32 %v877_v35, %v878_v39  ;;  %v653_v62 = vrot.slane %v652_v56, 1 }
 0x26c   :  { %v660_v55 = vrot.slane %v659_v41, 1  ;;  %v867_v61 = vmax.f32 %v865_v31, %v866_v44  ;;  %v678_v3 = vadd.f32 %v931_v59, %v633_v48  ;;  %v694_v31 = vsel %vm693_vm15, %v692_v4, %v676_v51 }
 0x26d   :  { %v636_v5 = vadd.f32 %v635_v54, %v634_v19  ;;  %v662_v50 = vadd.f32 %v612_v57, %v611_v25  ;;  %v880_v38 = vrot.slane %v879_v17, 2  ;;  %v654_v6 = vadd.f32 %v653_v62, %v652_v56 }
 0x26e   :  { %v799_v23 = vpop.permute.xlu1 %798  ;;  %v661_v28 = vadd.f32 %v660_v55, %v659_v41  ;;  %v695_v14 = vrot.slane %v678_v3, 6 }
 0x26f   :  { %v637_v9 = vrot.slane %v636_v5, 2  ;;  %vm809_vm5 = vcmp.eq.s32.totalorder %v938_v30, %v799_v23  ;;  %v663_v60 = vrot.slane %v662_v50, 4  ;;  %v881_v11 = vmax.f32 %v879_v17, %v880_v38 }
 0x270   :  { %v946_v37 = vsel %vm809_vm5, 1.0, %v1195_v2  ;;  %v868_v2 = vrot.slane %v867_v61, 1  ;;  %v681_v63 = vadd.f32 %v931_v59, %v654_v6  ;;  %v682_v18 = vadd.f32 %v931_v59, %v661_v28 }
 0x271   :  { %v638_v49 = vadd.f32 %v637_v9, %v636_v5  ;;  %v870_v0 = vsel %vm827_vm12, %v946_v37, -inf  ;;  %v664_v7 = vadd.f32 %v663_v60, %v662_v50  ;;  %v882_v19 = vrot.slane %v881_v11, 1 }
 0x272   :  { %v871_v8 = vrot.slane %v870_v0, 4  ;;  %v869_v39 = vmax.f32 %v867_v61, %v868_v2  ;;  %v697_v58 = vsel %vm696_vm0, %v695_v14, %v694_v31  ;;  %v704_v26 = vrot.slane %v681_v63, 3 }
 0x273   :  { %v639_v47 = vrot.slane %v638_v49, 1  ;;  %v665_v40 = vrot.slane %v664_v7, 2  ;;  %v707_v41 = vrot.slane %v682_v18, 2  ;;  %v883_v30 = vmax.f32 %v881_v11, %v882_v19 }
 0x274   :  { %v872_v20 = vmax.f32 %v870_v0, %v871_v8  ;;  %v896_v43 = vsel %vm705_vm6, %v869_v39, %v895_v33 }
 0x275   :  { %v640_v32 = vadd.f32 %v639_v47, %v638_v49  ;;  %v666_v12 = vadd.f32 %v665_v40, %v664_v7 }
 0x276   :  { %v873_v13 = vrot.slane %v872_v20, 2 }
 0x277   :  { %v679_v27 = vadd.f32 %v931_v59, %v640_v32  ;;  %v667_v16 = vrot.slane %v666_v12, 1 }
 0x278   :  { %v874_v35 = vmax.f32 %v872_v20, %v873_v13 }
 0x279   :  { %v698_v36 = vrot.slane %v679_v27, 5  ;;  %v668_v15 = vadd.f32 %v667_v16, %v666_v12 }
 0x27a   :  { %v875_v46 = vrot.slane %v874_v35, 1 }
 0x27b   :  { %v700_v56 = vsel %vm699_vm3, %v698_v36, %v697_v58  ;;  %v683_v34 = vadd.f32 %v931_v59, %v668_v15 }
 0x27c   :  { %v876_v54 = vmax.f32 %v874_v35, %v875_v46  ;;  %v703_v57 = vsel %vm702_vm4, %v701_v22, %v700_v56 }
 0x27d   :  { %v706_v25 = vsel %vm705_vm6, %v704_v26, %v703_v57  ;;  %v710_v17 = vrot.slane %v683_v34, 1 }
 0x27e   :  { %v709_v44 = vsel %vm708_vm7, %v707_v41, %v706_v25  ;;  %v897_v5 = vsel %vm708_vm7, %v876_v54, %v896_v43 }
 0x27f   :  { %v898_v52 = vsel %vm711_vm8, %v883_v30, %v897_v5  ;;  %v712_v45 = vsel %vm711_vm8, %v710_v17, %v709_v44 }
 0x280   :  { %900 = vst [vmem:[#allocation6] sm:$0xff] %v898_v52  ;;  %714 = vst [vmem:[#allocation5] sm:$0xff] %v712_v45 }
 0x281   :  { %1156 = shalt.err (!%p1153_p9)
}
 0x282   :  { %920 = dma.vmem_to_hbm [thread:$0]  %s918_s6, 128, %s1621_s8, [#allocation7]  }
 0x283   :  { %s1165_s15 = scalar_lea.vmem %s908_s12, 128  ;;  %p1170_p11 = scmp.lt.s32.totalorder %s908_s12, %s908_s12 }
 0x284   :  { %p1166_p10 = scmp.ne.s32.totalorder %s908_s12, %s1165_s15  ;;  %p1171_p12 = scmp.lt.s32.totalorder %s1165_s15, %s1165_s15 }
 0x286   :  { %p1172_p13 = por %p1171_p12, %p1170_p11 }
 0x288   :  { %p1173_p0 = pnand %p1172_p13, %p1166_p10 }
 0x28a   :  { %1176 = shalt.err (!%p1173_p0)
}
 0x28b   :  { %910 = dma.vmem_to_hbm [thread:$0]  %s908_s12, 128, %s1620_s7, [#allocation4]  }
 0x28c   :  { %1187 = dma.done.wait [#allocation4], 128  }
 0x28d   :  { %1188 = vsyncadd [#allocation4], 4294967168 }
 0x28e   :  { %1189 = dma.done.wait [#allocation7], 128  }
 0x28f   :  { %1190 = vsyncadd [#allocation7], 4294967168 }
 0x290   :  { %927 = vsyncpa [#allocation3], 1 }
 0x291   :  { %928 = vsyncpa [#allocation4], 1 }
 0x292   :  { %929 = vsyncpa [#allocation7], 1 }

</bundles_post_ra>
